<compile_context>
chip_gen: v7x
topology: tpu7x:2x2x1
jax: 0.10.0
libtpu: 0.0.40
codegen_flags: <defaults>
</compile_context>

<pallas_src>
import functools

import jax
import jax.numpy as jnp
from jax.experimental import pallas as pl
from jax.experimental.pallas import tpu as pltpu


def _round_up(x, m):
    return ((x + m - 1) // m) * m


def _mlp_kernel(num_layers, *refs):
    """refs = (x_ref, w0_ref, b0_ref, w1_ref, b1_ref, ..., o_ref).

    x_ref: (bm, K0); w_l: (K_l, H_l); b_l: (1, H_l); o_ref: (bm, H_last).
    Activation is carried in registers/VMEM across the unrolled layer loop —
    it never touches HBM.
    """
    x_ref = refs[0]
    o_ref = refs[-1]
    wb = refs[1:-1]

    act = x_ref[...].astype(jnp.float32)
    for l in range(num_layers):
        w_ref = wb[2 * l]
        b_ref = wb[2 * l + 1]
        act = jnp.dot(act, w_ref[...], preferred_element_type=jnp.float32)
        act = jnp.maximum(act + b_ref[...], 0.0)   # bias broadcast (1,H) -> (bm,H)
    o_ref[...] = act.astype(o_ref.dtype)


def mlp_forward(x, weights_t, biases, *, bm=128):
    """Fused forward: relu(...relu(x @ W0 + b0)... @ W_{L-1} + b_{L-1}).

    x:         (M, K0) float32
    weights_t: list of (K_l, H_l) float32, pre-transposed to (in, out)
    biases:    list of (H_l,) float32
    """
    M, K0 = x.shape
    L = len(weights_t)
    assert L == len(biases) and L >= 1
    assert weights_t[0].shape[0] == K0
    H_last = weights_t[-1].shape[1]

    # Batch tiling: clamp the tile to the (8-aligned) batch, then zero-pad the
    # batch to a multiple of the tile so the grid is exact.  Padded rows produce
    # relu(b)-garbage that is sliced away afterwards.
    bm_eff = min(bm, _round_up(M, 8))
    Mp = _round_up(M, bm_eff)
    x_p = x if Mp == M else jnp.pad(x, ((0, Mp - M), (0, 0)))

    grid = (Mp // bm_eff,)

    in_specs = [pl.BlockSpec((bm_eff, K0), lambda i: (i, 0))]   # batch tile of x
    inputs = [x_p]
    for w_t, b in zip(weights_t, biases):
        Kl, Hl = w_t.shape
        in_specs.append(pl.BlockSpec((Kl, Hl), lambda i: (0, 0)))  # resident weight
        in_specs.append(pl.BlockSpec((1, Hl), lambda i: (0, 0)))   # resident bias
        inputs.append(w_t)
        inputs.append(b.reshape(1, Hl))

    out_specs = pl.BlockSpec((bm_eff, H_last), lambda i: (i, 0))

    # Explicit VMEM budget: resident weights/biases (x2 safety for buffering) +
    # double-buffered x and out batch tiles + headroom.
    f32 = 4
    resident = sum(w.size * f32 + b.size * f32 for w, b in zip(weights_t, biases))
    tiles = 2 * bm_eff * K0 * f32 + 2 * bm_eff * H_last * f32
    vmem_limit = min(100 * 1024 * 1024, 2 * resident + tiles + 4 * 1024 * 1024)

    out = pl.pallas_call(
        functools.partial(_mlp_kernel, L),
        out_shape=jax.ShapeDtypeStruct((Mp, H_last), x.dtype),
        grid_spec=pltpu.PrefetchScalarGridSpec(
            num_scalar_prefetch=0,
            grid=grid,
            in_specs=in_specs,
            out_specs=out_specs,
        ),
        compiler_params=pltpu.CompilerParams(
            dimension_semantics=("parallel",),
            vmem_limit_bytes=int(vmem_limit),
        ),
    )(*inputs)

    return out[:M] if Mp != M else out


class MLPPallas:
    """JAX/Pallas port of rl_algos.net.MLP (Linear+ReLU stack, fused kernel)."""

    def __init__(self, input_dim, num_layers=2, hidden_layer_size=512, *, key=None):
        self.input_dim = input_dim
        self.feature_dim = hidden_layer_size
        if key is None:
            key = jax.random.PRNGKey(0)
        # Store weights pre-transposed to (in_dim, out_dim) ONCE — no per-forward w.T.
        self.weights_t = []
        self.biases = []
        in_dim = input_dim
        for _ in range(num_layers):
            key, wk, bk = jax.random.split(key, 3)
            # Mimic PyTorch nn.Linear default init: U(-1/sqrt(fan_in), 1/sqrt(fan_in)).
            bound = 1.0 / float(in_dim) ** 0.5
            w = jax.random.uniform(
                wk, (hidden_layer_size, in_dim), jnp.float32, -bound, bound
            )  # PyTorch layout (out, in)
            b = jax.random.uniform(
                bk, (hidden_layer_size,), jnp.float32, -bound, bound
            )
            self.weights_t.append(jnp.asarray(w.T))   # (in, out), materialized once
            self.biases.append(b)
            in_dim = hidden_layer_size

    def __call__(self, x):
        return mlp_forward(x, self.weights_t, self.biases)


def _reference_forward(weights_t, biases, x):
    for w_t, b in zip(weights_t, biases):
        x = jnp.maximum(x @ w_t + b, 0.0)
    return x


if __name__ == "__main__":
    key = jax.random.PRNGKey(0)
    key, xkey, mkey = jax.random.split(key, 3)

    batch, input_dim, hidden = 8, 32, 128   # small, TPU-aligned demo shapes
    x = jax.random.normal(xkey, (batch, input_dim), jnp.float32)

    mlp = MLPPallas(input_dim, num_layers=2, hidden_layer_size=hidden, key=mkey)

    out = mlp(x)
    out = jax.block_until_ready(out)

    ref = _reference_forward(mlp.weights_t, mlp.biases, x)
    assert out.shape == (batch, hidden)
    assert jnp.allclose(out, ref, atol=1e-5, rtol=1e-5), "mismatch vs JAX reference"

    print("KERNEL_OK")
</pallas_src>

<mosaic_0001>
module attributes {stable_mosaic.version = 11 : i64} {
  func.func @_mlp_kernel(%arg0: i32, %arg1: memref<8x32xf32, #tpu.memory_space<vmem>>, %arg2: memref<32x128xf32, #tpu.memory_space<vmem>>, %arg3: memref<1x128xf32, #tpu.memory_space<vmem>>, %arg4: memref<128x128xf32, #tpu.memory_space<vmem>>, %arg5: memref<1x128xf32, #tpu.memory_space<vmem>>, %arg6: memref<8x128xf32, #tpu.memory_space<vmem>>) attributes {dimension_semantics = [#tpu.dimension_semantics<parallel>], iteration_bounds = array<i64: 1>, scalar_prefetch = 0 : i64, scratch_operands = 0 : i64, tpu.core_type = #tpu.core_type<tc>, window_params = [{transform_indices = @transform_0, window_bounds = array<i64: 8, 32>}, {pipeline_mode = #tpu.pipeline_mode<synchronous>, transform_indices = @transform_1, window_bounds = array<i64: 32, 128>}, {pipeline_mode = #tpu.pipeline_mode<synchronous>, transform_indices = @transform_2, window_bounds = array<i64: 1, 128>}, {pipeline_mode = #tpu.pipeline_mode<synchronous>, transform_indices = @transform_3, window_bounds = array<i64: 128, 128>}, {pipeline_mode = #tpu.pipeline_mode<synchronous>, transform_indices = @transform_4, window_bounds = array<i64: 1, 128>}, {transform_indices = @transform_5, window_bounds = array<i64: 8, 128>}]} {
    %c0 = arith.constant 0 : index
    %c0_0 = arith.constant 0 : index
    %0 = vector.load %arg1[%c0, %c0_0] : memref<8x32xf32, #tpu.memory_space<vmem>>, vector<8x32xf32>
    %c0_1 = arith.constant 0 : index
    %c0_2 = arith.constant 0 : index
    %1 = vector.load %arg2[%c0_1, %c0_2] : memref<32x128xf32, #tpu.memory_space<vmem>>, vector<32x128xf32>
    %cst = arith.constant dense<0.000000e+00> : vector<8x128xf32>
    %2 = tpu.matmul %0, %1, %cst {dimension_numbers = #tpu.dot_dimension_numbers<[1], [0], [0], [1], [0, 0, 1, 1], [], []>} : vector<8x32xf32>, vector<32x128xf32>, vector<8x128xf32> -> vector<8x128xf32>
    %c0_3 = arith.constant 0 : index
    %c0_4 = arith.constant 0 : index
    %3 = vector.load %arg3[%c0_3, %c0_4] : memref<1x128xf32, #tpu.memory_space<vmem>>, vector<1x128xf32>
    %4 = vector.broadcast %3 : vector<1x128xf32> to vector<8x128xf32>
    %5 = arith.addf %2, %4 : vector<8x128xf32>
    %cst_5 = arith.constant 0.000000e+00 : f32
    %6 = vector.broadcast %cst_5 : f32 to vector<8x128xf32>
    %7 = arith.maximumf %5, %6 : vector<8x128xf32>
    %c0_6 = arith.constant 0 : index
    %c0_7 = arith.constant 0 : index
    %8 = vector.load %arg4[%c0_6, %c0_7] : memref<128x128xf32, #tpu.memory_space<vmem>>, vector<128x128xf32>
    %cst_8 = arith.constant dense<0.000000e+00> : vector<8x128xf32>
    %9 = tpu.matmul %7, %8, %cst_8 {dimension_numbers = #tpu.dot_dimension_numbers<[1], [0], [0], [1], [0, 0, 1, 1], [], []>} : vector<8x128xf32>, vector<128x128xf32>, vector<8x128xf32> -> vector<8x128xf32>
    %c0_9 = arith.constant 0 : index
    %c0_10 = arith.constant 0 : index
    %10 = vector.load %arg5[%c0_9, %c0_10] : memref<1x128xf32, #tpu.memory_space<vmem>>, vector<1x128xf32>
    %11 = vector.broadcast %10 : vector<1x128xf32> to vector<8x128xf32>
    %12 = arith.addf %9, %11 : vector<8x128xf32>
    %cst_11 = arith.constant 0.000000e+00 : f32
    %13 = vector.broadcast %cst_11 : f32 to vector<8x128xf32>
    %14 = arith.maximumf %12, %13 : vector<8x128xf32>
    %c0_12 = arith.constant 0 : index
    %c0_13 = arith.constant 0 : index
    %15 = vector.load %arg6[%c0_12, %c0_13] : memref<8x128xf32, #tpu.memory_space<vmem>>, vector<8x128xf32>
    tpu.vector_store %arg6[%c0_12, %c0_13], %14 {strides = array<i32>} : memref<8x128xf32, #tpu.memory_space<vmem>>, vector<8x128xf32>,
    return
  }
  func.func @transform_0(%arg0: i32) -> (i32, i32) {
    %c0_i32 = arith.constant 0 : i32
    %c0_i32_0 = arith.constant 0 : i32
    return %arg0, %c0_i32 : i32, i32
  }
  func.func @transform_1(%arg0: i32) -> (i32, i32) {
    %c0_i32 = arith.constant 0 : i32
    %c0_i32_0 = arith.constant 0 : i32
    %c0_i32_1 = arith.constant 0 : i32
    return %c0_i32, %c0_i32_0 : i32, i32
  }
  func.func @transform_2(%arg0: i32) -> (i32, i32) {
    %c0_i32 = arith.constant 0 : i32
    %c0_i32_0 = arith.constant 0 : i32
    %c0_i32_1 = arith.constant 0 : i32
    return %c0_i32, %c0_i32_0 : i32, i32
  }
  func.func @transform_3(%arg0: i32) -> (i32, i32) {
    %c0_i32 = arith.constant 0 : i32
    %c0_i32_0 = arith.constant 0 : i32
    %c0_i32_1 = arith.constant 0 : i32
    return %c0_i32, %c0_i32_0 : i32, i32
  }
  func.func @transform_4(%arg0: i32) -> (i32, i32) {
    %c0_i32 = arith.constant 0 : i32
    %c0_i32_0 = arith.constant 0 : i32
    %c0_i32_1 = arith.constant 0 : i32
    return %c0_i32, %c0_i32_0 : i32, i32
  }
  func.func @transform_5(%arg0: i32) -> (i32, i32) {
    %c0_i32 = arith.constant 0 : i32
    %c0_i32_0 = arith.constant 0 : i32
    return %arg0, %c0_i32 : i32, i32
  }
}

</mosaic_0001>

<bundles_post_ra>
// kernel: tpu_custom_call.1
= control target key start
LH: loop header
LB: loop body
LE: loop exit
PB: predicated region body
PF: predicated region fallthrough
CT: control target
= control target key end

     0   :  { %10 = vsyncpa [#allocation3], 0  ;;  %s561_s0 = inlined_call_operand.hbm [shape: f32[8,32], index: 0, kind: input, shape index: {}]   ;;  %s562_s1 = inlined_call_operand.hbm [shape: f32[32,128], index: 1, kind: input, shape index: {}]   ;;  %s563_s2 = inlined_call_operand.vmem [shape: f32[1,128], index: 2, kind: input, shape index: {}]   ;;  %s564_s3 = inlined_call_operand.hbm [shape: f32[128,128], index: 3, kind: input, shape index: {}]   ;;  %s565_s4 = inlined_call_operand.vmem [shape: f32[1,128], index: 4, kind: input, shape index: {}]   ;;  %s566_s5 = inlined_call_operand.hbm [shape: f32[8,128], index: 5, kind: output, shape index: {}]  }
   0x1   :  { %11 = vsyncpa [#allocation6], 0 }
   0x2   :  { %12 = vsyncpa [#allocation4], 0  ;;  %s462_s18 = smov [#allocation5]   ;;  %s368_s22 = scalar_lea.hbm %s562_s1, 512 }
   0x3   :  { %s28_s19 = sshll.u32 %s462_s18, 4  ;;  %p369_p0 = scmp.ne.s32.totalorder %s562_s1, %s368_s22  ;;  %s29_s19 = int_to_ptr.vmem [resolvable:$true] %s28_s19 }
   0x4   :  { %p372_p1 = scmp.lt.u32.totalorder %s368_s22, %s562_s1 }
   0x6   :  { %p374_p2 = pnand %p372_p1, %p369_p0 }
   0x8   :  { %377 = shalt.err (!%p374_p2)
}
   0x9   :  { %s378_s27 = scalar_lea.vmem %s29_s19, 512  ;;  %p383_p4 = scmp.lt.s32.totalorder %s29_s19, %s29_s19 }
   0xa   :  { %p379_p3 = scmp.ne.s32.totalorder %s29_s19, %s378_s27  ;;  %p384_p5 = scmp.lt.s32.totalorder %s378_s27, %s378_s27 }
   0xc   :  { %p385_p6 = por %p384_p5, %p383_p4 }
   0xe   :  { %p386_p7 = pnand %p385_p6, %p379_p3 }
  0x10   :  { %389 = shalt.err (!%p386_p7)
}
  0x11   :  { %s463_s28 = smov 128   ;;  %s464_s29 = smov 8  }
  0x12   :  { %34 = dma.hbm_to_vmem [thread:$0]  %s562_s1, 512, %s29_s19, [#allocation6], %s463_s28, %s463_s28, %s464_s29  }
  0x13   :  { %s465_s7 = smov [#allocation2]   ;;  %s466_s9 = smov [#allocation7]  }
  0x14   :  { %s19_s8 = sshll.u32 %s465_s7, 4  ;;  %s42_s10 = sshll.u32 %s466_s9, 4  ;;  %s20_s8 = int_to_ptr.vmem [resolvable:$true] %s19_s8  ;;  %s43_s10 = int_to_ptr.vmem [resolvable:$true] %s42_s10 }
  0x15   :  { %s390_s13 = scalar_lea.hbm %s561_s0, 128 }
  0x16   :  { %p391_p8 = scmp.ne.s32.totalorder %s561_s0, %s390_s13  ;;  %p394_p9 = scmp.lt.u32.totalorder %s390_s13, %s561_s0 }
  0x18   :  { %p396_p10 = pnand %p394_p9, %p391_p8 }
  0x1a   :  { %399 = shalt.err (!%p396_p10)
}
  0x1b   :  { %s400_s1 = scalar_lea.vmem %s20_s8, 128  ;;  %p405_p12 = scmp.lt.s32.totalorder %s20_s8, %s20_s8 }
  0x1c   :  { %p401_p11 = scmp.ne.s32.totalorder %s20_s8, %s400_s1  ;;  %p406_p13 = scmp.lt.s32.totalorder %s400_s1, %s400_s1 }
  0x1e   :  { %p407_p0 = por %p406_p13, %p405_p12 }
  0x20   :  { %p408_p1 = pnand %p407_p0, %p401_p11 }
  0x22   :  { %411 = shalt.err (!%p408_p1)
}
  0x23   :  { %22 = dma.hbm_to_vmem [thread:$0]  %s561_s0, 128, %s20_s8, [#allocation3]  }
  0x24   :  { %s412_s22 = scalar_lea.hbm %s564_s3, 2048 }
  0x25   :  { %p413_p2 = scmp.ne.s32.totalorder %s564_s3, %s412_s22  ;;  %p416_p3 = scmp.lt.u32.totalorder %s412_s22, %s564_s3 }
  0x27   :  { %p418_p4 = pnand %p416_p3, %p413_p2 }
  0x29   :  { %421 = shalt.err (!%p418_p4)
}
  0x2a   :  { %s422_s27 = scalar_lea.vmem %s43_s10, 2048  ;;  %p427_p6 = scmp.lt.s32.totalorder %s43_s10, %s43_s10 }
  0x2b   :  { %p423_p5 = scmp.ne.s32.totalorder %s43_s10, %s422_s27  ;;  %p428_p7 = scmp.lt.s32.totalorder %s422_s27, %s422_s27 }
  0x2d   :  { %p429_p8 = por %p428_p7, %p427_p6 }
  0x2f   :  { %p430_p9 = pnand %p429_p8, %p423_p5 }
  0x31   :  { %433 = shalt.err (!%p430_p9)
}
  0x32   :  { %48 = dma.hbm_to_vmem [thread:$0]  %s564_s3, 2048, %s43_s10, [#allocation6], %s463_s28, %s463_s28, %s464_s29  }
  0x33   :  { %456 = dma.done.wait [#allocation3], 128  }
  0x34   :  { %457 = vsyncadd [#allocation3], 4294967168 }
  0x35   :  { %458 = dma.done.wait [#allocation6], 2560  }
  0x36   :  { %459 = vsyncadd [#allocation6], 4294964736  ;;  %v467_v0 = vmov 0.0|0.0   ;;  %vm468_vm0 = vmmov 0   ;;  %v469_v1 = vmov 0.0   ;;  %v61_v2 = vld [vmem:[#allocation5] sm:$0xff] }
  0x37   :  { %329 = vmatprep.subr.bf16.mxu0 %v467_v0  ;;  %291 = vmatprep.mubr.msk.f32.mxu0 %vm468_vm0, %v469_v1  ;;  %v62_v3 = vld [vmem:[#allocation5 + $0x8] sm:$0xff]  ;;  %v63_v4 = vld [vmem:[#allocation5 + $0x10] sm:$0xff]  ;;  %v64_v6 = vld [vmem:[#allocation5 + $0x18] sm:$0xff]  ;;  %vm72_vm1 = vcmask 261120   ;;  %s470_s7 = smov [#allocation8]  }
  0x38   :  { %335 = vmatprep.subr.bf16.mxu1 %v467_v0  ;;  %326 = vmatprep.mubr.msk.f32.mxu1 %vm468_vm0, %v469_v1  ;;  %v330_v5 = vpack.c.bf16 %v62_v3, %v61_v2  ;;  %v147_v7 = vld [vmem:[#allocation7] sm:$0xff]  ;;  %v148_v8 = vld [vmem:[#allocation7 + $0x8] sm:$0xff]  ;;  %v149_v9 = vld [vmem:[#allocation7 + $0x10] sm:$0xff]  ;;  %v333_v11 = vpack.c.bf16 %v64_v6, %v63_v4  ;;  %s248_s8 = sshll.u32 %s470_s7, 4  ;;  %s249_s8 = int_to_ptr.vmem [resolvable:$true] %s248_s8 }
  0x39   :  { %v150_v10 = vld [vmem:[#allocation7 + $0x18] sm:$0xff]  ;;  %v336_v12 = vpack.c.bf16 %v148_v8, %v147_v7  ;;  %v151_v14 = vld [vmem:[#allocation7 + $0x20] sm:$0xff]  ;;  %v152_v15 = vld [vmem:[#allocation7 + $0x28] sm:$0xff]  ;;  %s434_s9 = scalar_lea.vmem %s249_s8, 128  ;;  %p439_p11 = scmp.lt.s32.totalorder %s249_s8, %s249_s8 }
  0x3a   :  { %331 = vmatpush3.bf16.msra.mxu0 %v330_v5  ;;  %v339_v13 = vpack.c.bf16 %v150_v10, %v149_v9  ;;  %v60_v16 = vld [vmem:[#allocation2] sm:$0xff]  ;;  %v342_v17 = vpack.c.bf16 %v152_v15, %v151_v14  ;;  %v153_v18 = vld [vmem:[#allocation7 + $0x30] sm:$0xff]  ;;  %v155_v21 = vld [vmem:[#allocation7 + $0x40] sm:$0xff]  ;;  %p435_p10 = scmp.ne.s32.totalorder %s249_s8, %s434_s9  ;;  %p440_p12 = scmp.lt.s32.totalorder %s434_s9, %s434_s9 }
  0x3b   :  { %332 = vmatprep.subr.bf16.mxu0 %v467_v0  ;;  %337 = vmatpush3.bf16.msra.mxu1 %v336_v12  ;;  %v154_v19 = vld [vmem:[#allocation7 + $0x38] sm:$0xff]  ;;  %v156_v22 = vld [vmem:[#allocation7 + $0x48] sm:$0xff]  ;;  %v157_v24 = vld [vmem:[#allocation7 + $0x50] sm:$0xff] }
  0x3c   :  { %338 = vmatprep.subr.bf16.mxu1 %v467_v0  ;;  %v345_v20 = vpack.c.bf16 %v154_v19, %v153_v18  ;;  %v348_v23 = vpack.c.bf16 %v156_v22, %v155_v21  ;;  %v158_v25 = vld [vmem:[#allocation7 + $0x58] sm:$0xff]  ;;  %v159_v27 = vld [vmem:[#allocation7 + $0x60] sm:$0xff]  ;;  %v160_v28 = vld [vmem:[#allocation7 + $0x68] sm:$0xff]  ;;  %p441_p13 = por %p440_p12, %p439_p11 }
  0x3d   :  { %v351_v26 = vpack.c.bf16 %v158_v25, %v157_v24  ;;  %v354_v29 = vpack.c.bf16 %v160_v28, %v159_v27  ;;  %v161_v30 = vld [vmem:[#allocation7 + $0x70] sm:$0xff]  ;;  %v162_v31 = vld [vmem:[#allocation7 + $0x78] sm:$0xff] }
  0x3e   :  { %334 = vmatpush3.bf16.msra.mxu0 %v333_v11  ;;  %v357_v32 = vpack.c.bf16 %v162_v31, %v161_v30  ;;  %v258_v33 = vld [vmem:[%s563_s2] ss:$0 sm:$0xff]  ;;  %p442_p0 = pnand %p441_p13, %p435_p10 }
  0x3f   :  { %340 = vmatpush3.bf16.msra.mxu1 %v339_v13  ;;  %v260_v38 = vld [vmem:[%s565_s4] ss:$0 sm:$0xff] }
  0x40   :  { %341 = vmatprep.subr.bf16.mxu1 %v467_v0 }
  0x41   :  { %292 = vmatmul.mubr.msk.f32.vlgmr.msra.gmra.mrb[0].mxu0 %vm72_vm1, %v60_v16 }
  0x43   :  { %343 = vmatpush3.bf16.msra.mxu1 %v342_v17 }
  0x44   :  { %344 = vmatprep.subr.bf16.mxu1 %v467_v0 }
  0x47   :  { %346 = vmatpush3.bf16.msra.mxu1 %v345_v20 }
  0x48   :  { %347 = vmatprep.subr.bf16.mxu1 %v467_v0 }
  0x4b   :  { %349 = vmatpush3.bf16.msra.mxu1 %v348_v23 }
  0x4c   :  { %350 = vmatprep.subr.bf16.mxu1 %v467_v0 }
  0x4f   :  { %352 = vmatpush3.bf16.msra.mxu1 %v351_v26 }
  0x50   :  { %353 = vmatprep.subr.bf16.mxu1 %v467_v0 }
  0x53   :  { %355 = vmatpush3.bf16.msra.mxu1 %v354_v29 }
  0x54   :  { %356 = vmatprep.subr.bf16.mxu1 %v467_v0 }
  0x57   :  { %358 = vmatpush3.bf16.msra.mxu1 %v357_v32 }
 0x114   :  { %v142_v34 = vpop.f32.mrb[0].mxu0 }
 0x115   :  { %v143_v35 = vadd.f32 %v258_v33, %v142_v34  ;;  %v293_v36 = vpop.f32.mrb[1].mxu0 }
 0x117   :  { %v146_v37 = vmax.f32 %v143_v35, 0.0 }
 0x119   :  { %327 = vmatmul.mubr.f32.vlgmr.msra.gmra.mrb[0].mxu1 %v146_v37 }
 0x1ec   :  { %v236_v39 = vpop.f32.mrb[0].mxu1 }
 0x1ed   :  { %v237_v40 = vadd.f32 %v260_v38, %v236_v39  ;;  %v328_v41 = vpop.f32.mrb[1].mxu1 }
 0x1ef   :  { %v240_v42 = vmax.f32 %v237_v40, 0.0 }
 0x1f1   :  { %241 = vst [vmem:[#allocation8] sm:$0xff] %v240_v42 }
 0x1f2   :  { %445 = shalt.err (!%p442_p0)
}
 0x1f3   :  { %s446_s11 = scalar_lea.hbm %s566_s5, 128 }
 0x1f4   :  { %p447_p1 = scmp.ne.s32.totalorder %s566_s5, %s446_s11  ;;  %p450_p2 = scmp.lt.u32.totalorder %s446_s11, %s566_s5 }
 0x1f6   :  { %p452_p3 = pnand %p450_p2, %p447_p1 }
 0x1f8   :  { %455 = shalt.err (!%p452_p3)
}
 0x1f9   :  { %251 = dma.vmem_to_hbm [thread:$0]  %s249_s8, 128, %s566_s5, [#allocation4]  }
 0x1fa   :  { %460 = dma.done.wait [#allocation4], 128  }
 0x1fb   :  { %461 = vsyncadd [#allocation4], 4294967168 }
 0x1fc   :  { %255 = vsyncpa [#allocation3], 1 }
 0x1fd   :  { %256 = vsyncpa [#allocation6], 1 }
 0x1fe   :  { %257 = vsyncpa [#allocation4], 1 }

</bundles_post_ra>
